<compile_context>
chip_gen: v7x
topology: tpu7x:2x2x1
jax: 0.10.0
libtpu: 0.0.40
codegen_flags: <defaults>
</compile_context>

<pallas_src>
from functools import partial

import jax
import jax.numpy as jnp
from jax.experimental import pallas as pl
from jax.experimental.pallas import tpu as pltpu


# ---------------------------------------------------------------------------
# Kernel
# ---------------------------------------------------------------------------
def _flash_attn_kernel(*refs, s_kv, tk, num_kv_chunks, compute_dtype, prob_dtype,
                       has_mask):
    if has_mask:
        q_ref, k_ref, v_ref, mask_ref, o_ref = refs
    else:
        q_ref, k_ref, v_ref, o_ref = refs
        mask_ref = None

    tq = q_ref.shape[2]
    d = q_ref.shape[3]

    q = q_ref[0, 0].astype(compute_dtype)                     # (tq, D)

    m = None        # running row max        (tq, 1) f32
    l = None        # running denominator    (tq, 1) f32
    acc = None      # output accumulator     (tq, D) f32

    # Static (trace-time) loop over KV chunks; K/V are already resident in VMEM,
    # so this only bounds the (tq, tk) score/prob intermediates, not HBM traffic.
    for c in range(num_kv_chunks):
        start = c * tk
        k = k_ref[0, 0, start:start + tk, :].astype(compute_dtype)   # (tk, D)
        v = v_ref[0, 0, start:start + tk, :].astype(compute_dtype)   # (tk, D)

        # Q @ K^T without materializing K.T: contract last dims of both operands.
        s = jax.lax.dot_general(
            q, k, dimension_numbers=(((1,), (1,)), ((), ())),
            preferred_element_type=jnp.float32)                      # (tq, tk) f32

        if has_mask:
            keep = mask_ref[0, 0, :, start:start + tk] != 0
            s = jnp.where(keep, s, jnp.float32(-1e9))
        elif start + tk > s_kv:
            # Zero-padded keys (no user mask): must not contribute to the softmax.
            col = jax.lax.broadcasted_iota(jnp.int32, (tq, tk), 1) + start
            s = jnp.where(col < s_kv, s, jnp.float32(-1e9))

        if c == 0:
            m = jnp.max(s, axis=-1, keepdims=True)
            p = jnp.exp((s - m).astype(prob_dtype))                  # unnormalized probs
            l = jnp.sum(p.astype(jnp.float32), axis=-1, keepdims=True)
            acc = jnp.dot(p.astype(compute_dtype), v,
                          preferred_element_type=jnp.float32)
        else:
            m_new = jnp.maximum(m, jnp.max(s, axis=-1, keepdims=True))
            alpha = jnp.exp(m - m_new)                               # (tq, 1) f32
            p = jnp.exp((s - m_new).astype(prob_dtype))
            l = alpha * l + jnp.sum(p.astype(jnp.float32), axis=-1, keepdims=True)
            acc = alpha * acc + jnp.dot(p.astype(compute_dtype), v,
                                        preferred_element_type=jnp.float32)
            m = m_new

    # Deferred normalization: exact reciprocal on (tq,1) is essentially free.
    inv = pl.reciprocal(l, approx=False)
    o_ref[0, 0] = (acc * inv).astype(o_ref.dtype)


# ---------------------------------------------------------------------------
# Wrapper helpers
# ---------------------------------------------------------------------------
def _probs_dtype_for(compute_dtype):
    """bf16 exp is an EUP win on v6e/v7x only; keep f32 elsewhere (v5e: no bf16 EUP)."""
    if jnp.dtype(compute_dtype) != jnp.dtype(jnp.bfloat16):
        return jnp.float32
    try:
        kind = jax.devices()[0].device_kind.lower()
    except Exception:
        kind = ""
    if ("v6" in kind) or ("v7" in kind):
        return jnp.bfloat16
    return jnp.float32


def _mask_index_map(m_b, m_h):
    if m_b > 1 and m_h > 1:
        return lambda b, h, qi: (b, h, qi, 0)
    if m_b > 1:
        return lambda b, h, qi: (b, 0, qi, 0)
    if m_h > 1:
        return lambda b, h, qi: (0, h, qi, 0)
    return lambda b, h, qi: (0, 0, qi, 0)


def _vmem_limit_bytes(tq, tk, skv_pad, d, qkv_itemsize, out_itemsize,
                      mask_itemsize, prob_itemsize):
    dbl = 2                                                   # pipeline double-buffering
    kv_res = dbl * 2 * skv_pad * d * qkv_itemsize             # resident K + V blocks
    qo = dbl * tq * d * (qkv_itemsize + out_itemsize)         # Q tile + O tile
    msk = dbl * tq * skv_pad * mask_itemsize
    interm = tq * tk * (4 + prob_itemsize) + tq * d * 4 + 8 * tq  # s, p, acc, m/l
    est = kv_res + qo + msk + 2 * interm
    # v7x has 64 MiB physical VMEM; a plan exceeding that must be re-tiled anyway.
    return int(min(128 * 1024 * 1024, max(32 * 1024 * 1024, int(est * 1.5))))


# ---------------------------------------------------------------------------
# Public entry point
# ---------------------------------------------------------------------------
def self_attention(Q, K, V, mask=None, *, block_q=512, block_kv=512,
                   compute_dtype=jnp.bfloat16, prob_dtype=None):
    """Pallas TPU self-attention (no 1/sqrt(d_k) scaling, matching the reference).

    Q: (B, H, Sq, D); K, V: (B, H, Skv, D).  mask: broadcastable to (B, H, Sq, Skv),
    positions where mask == 0 get -1e9 before the softmax.  For minimal HBM traffic
    ship Q/K/V in bf16 and the mask as int8/bool.  `compute_dtype` is the MXU operand
    dtype (accumulation is always f32)."""
    assert Q.ndim == 4 and K.ndim == 4 and V.ndim == 4
    B, H, Sq, D = Q.shape
    Skv = K.shape[2]
    assert K.shape == (B, H, Skv, D) and V.shape == (B, H, Skv, D)

    has_mask = mask is not None
    compute_dtype = jnp.dtype(compute_dtype)
    prob_dtype = jnp.dtype(_probs_dtype_for(compute_dtype) if prob_dtype is None
                           else prob_dtype)

    # ---- tile plan (tq mult of 8/16, tk mult of 128/256 via defaults) ----
    assert block_q % 16 == 0 and block_kv % 128 == 0
    tq = Sq if Sq <= block_q else block_q
    tk = Skv if Skv <= block_kv else block_kv
    sq_pad = -(-Sq // tq) * tq
    skv_pad = -(-Skv // tk) * tk
    num_kv_chunks = skv_pad // tk

    # ---- pad non-divisible sequences (no full-S tile fallback footgun) ----
    def _pad_rows(x, target):
        p = target - x.shape[2]
        return x if p == 0 else jnp.pad(x, ((0, 0), (0, 0), (0, p), (0, 0)))

    Qp = _pad_rows(Q, sq_pad)
    Kp = _pad_rows(K, skv_pad)
    Vp = _pad_rows(V, skv_pad)

    args = [Qp, Kp, Vp]
    in_specs = [
        pl.BlockSpec((1, 1, tq, D), lambda b, h, qi: (b, h, qi, 0)),
        # K/V index_map ignores qi -> blocks are resident per (b, h): fetched once
        # per head instead of Sq/tq times.
        pl.BlockSpec((1, 1, skv_pad, D), lambda b, h, qi: (b, h, 0, 0)),
        pl.BlockSpec((1, 1, skv_pad, D), lambda b, h, qi: (b, h, 0, 0)),
    ]

    mask_itemsize = 0
    if has_mask:
        # Left-pad dims to rank 4 (matches torch broadcasting of masked_fill).
        m4 = jnp.reshape(mask, (1,) * (4 - mask.ndim) + tuple(mask.shape))
        if m4.dtype == jnp.bool_:
            m4 = m4.astype(jnp.int8)          # same width, keeps DMA at 1 B/elem
        m_b, m_h = m4.shape[0], m4.shape[1]
        assert m4.shape[2] == Sq and m4.shape[3] == Skv
        assert m_b in (1, B) and m_h in (1, H)
        pq, pk = sq_pad - Sq, skv_pad - Skv
        if pq or pk:
            m4 = jnp.pad(m4, ((0, 0), (0, 0), (0, pq), (0, pk)))   # zeros => masked
        args.append(m4)
        in_specs.append(pl.BlockSpec((1, 1, tq, skv_pad), _mask_index_map(m_b, m_h)))
        mask_itemsize = m4.dtype.itemsize

    grid = (B, H, sq_pad // tq)
    out_spec = pl.BlockSpec((1, 1, tq, D), lambda b, h, qi: (b, h, qi, 0))

    kernel = partial(_flash_attn_kernel,
                     s_kv=Skv, tk=tk, num_kv_chunks=num_kv_chunks,
                     compute_dtype=compute_dtype, prob_dtype=prob_dtype,
                     has_mask=has_mask)

    vmem_limit = _vmem_limit_bytes(tq, tk, skv_pad, D,
                                   Q.dtype.itemsize, Q.dtype.itemsize,
                                   mask_itemsize, prob_dtype.itemsize)

    out = pl.pallas_call(
        kernel,
        out_shape=jax.ShapeDtypeStruct((B, H, sq_pad, D), Q.dtype),
        grid_spec=pltpu.PrefetchScalarGridSpec(
            num_scalar_prefetch=0,
            grid=grid,
            in_specs=in_specs,
            out_specs=out_spec),
        compiler_params=pltpu.CompilerParams(
            # Whole KV sweep is inside one program -> no cross-step state; every
            # grid axis is independent (megacore / v7x 2-TC friendly).
            dimension_semantics=("parallel", "parallel", "parallel"),
            vmem_limit_bytes=vmem_limit),
    )(*args)

    return out[:, :, :Sq, :] if sq_pad != Sq else out


# ---------------------------------------------------------------------------
# Pure-JAX reference (mirror of the PyTorch module)
# ---------------------------------------------------------------------------
def _reference(Q, K, V, mask=None, compute_dtype=jnp.float32):
    prec = jax.lax.Precision.HIGHEST
    q = Q.astype(compute_dtype)
    k = K.astype(compute_dtype)
    v = V.astype(compute_dtype)
    scores = jnp.einsum("bhqd,bhkd->bhqk", q, k,
                        preferred_element_type=jnp.float32, precision=prec)
    if mask is not None:
        m4 = jnp.reshape(mask, (1,) * (4 - mask.ndim) + tuple(mask.shape))
        scores = jnp.where(m4 == 0, jnp.float32(-1e9), scores)
    attn = jax.nn.softmax(scores, axis=-1)
    out = jnp.einsum("bhqk,bhkd->bhqd", attn.astype(compute_dtype), v,
                     preferred_element_type=jnp.float32, precision=prec)
    return out.astype(Q.dtype)


if __name__ == "__main__":
    key = jax.random.PRNGKey(0)

    # ---- small shapes implied by the module ----
    B, H, S, D = 2, 4, 8, 32
    kq, kk, kv, km = jax.random.split(key, 4)
    Q = jax.random.normal(kq, (B, H, S, D), dtype=jnp.float32)
    K = jax.random.normal(kk, (B, H, S, D), dtype=jnp.float32)
    V = jax.random.normal(kv, (B, H, S, D), dtype=jnp.float32)
    mask = (jax.random.uniform(km, (B, H, S, S)) > 0.3).astype(jnp.int8)  # caller ships int8

    # f32 compute path: matches the module semantics at tight tolerance.
    out_f32 = jax.block_until_ready(self_attention(Q, K, V, compute_dtype=jnp.float32))
    out_f32_m = jax.block_until_ready(
        self_attention(Q, K, V, mask, compute_dtype=jnp.float32))
    assert jnp.allclose(out_f32, _reference(Q, K, V), atol=1e-4, rtol=1e-4)
    assert jnp.allclose(out_f32_m, _reference(Q, K, V, mask), atol=1e-4, rtol=1e-4)

    # Default bf16 MXU-operand path (f32 accumulation) vs bf16-precision reference.
    out_bf = jax.block_until_ready(self_attention(Q, K, V))
    out_bf_m = jax.block_until_ready(self_attention(Q, K, V, mask))
    assert jnp.allclose(out_bf, _reference(Q, K, V, compute_dtype=jnp.bfloat16),
                        atol=3e-2, rtol=3e-2)
    assert jnp.allclose(out_bf_m, _reference(Q, K, V, mask, compute_dtype=jnp.bfloat16),
                        atol=3e-2, rtol=3e-2)

    # Non-divisible S: exercises padding, multi-chunk online softmax, the in-kernel
    # KV bound mask (unmasked case), and a head-shared (B,1,S,S) mask.
    B2, H2, S2, D2 = 1, 2, 200, 64
    kq2, kk2, kv2, km2 = jax.random.split(jax.random.PRNGKey(1), 4)
    Q2 = jax.random.normal(kq2, (B2, H2, S2, D2), dtype=jnp.float32)
    K2 = jax.random.normal(kk2, (B2, H2, S2, D2), dtype=jnp.float32)
    V2 = jax.random.normal(kv2, (B2, H2, S2, D2), dtype=jnp.float32)
    mask2 = (jax.random.uniform(km2, (B2, 1, S2, S2)) > 0.3).astype(jnp.int8)
    out2 = jax.block_until_ready(
        self_attention(Q2, K2, V2, block_q=128, block_kv=128,
                       compute_dtype=jnp.float32))
    out2_m = jax.block_until_ready(
        self_attention(Q2, K2, V2, mask2, block_q=128, block_kv=128,
                       compute_dtype=jnp.float32))
    assert jnp.allclose(out2, _reference(Q2, K2, V2), atol=1e-4, rtol=1e-4)
    assert jnp.allclose(out2_m, _reference(Q2, K2, V2, mask2), atol=1e-4, rtol=1e-4)

    # bf16-through-HBM contract: bf16 Q/K/V/O halves all attention DMA bytes.
    B3, H3, S3, D3 = 1, 2, 256, 64
    kq3, kk3, kv3, km3 = jax.random.split(jax.random.PRNGKey(2), 4)
    Q3 = jax.random.normal(kq3, (B3, H3, S3, D3), dtype=jnp.bfloat16)
    K3 = jax.random.normal(kk3, (B3, H3, S3, D3), dtype=jnp.bfloat16)
    V3 = jax.random.normal(kv3, (B3, H3, S3, D3), dtype=jnp.bfloat16)
    mask3 = (jax.random.uniform(km3, (B3, H3, S3, S3)) > 0.3).astype(jnp.int8)
    out3 = jax.block_until_ready(self_attention(Q3, K3, V3, mask3))
    assert jnp.allclose(out3, _reference(Q3, K3, V3, mask3, compute_dtype=jnp.bfloat16),
                        atol=3e-2, rtol=3e-2)

    print("KERNEL_OK")
</pallas_src>

<mosaic_0001>
module attributes {stable_mosaic.version = 11 : i64} {
  func.func @_flash_attn_kernel(%arg0: i32, %arg1: i32, %arg2: i32, %arg3: memref<1x1x8x32xf32, #tpu.memory_space<vmem>>, %arg4: memref<1x1x8x32xf32, #tpu.memory_space<vmem>>, %arg5: memref<1x1x8x32xf32, #tpu.memory_space<vmem>>, %arg6: memref<1x1x8x32xf32, #tpu.memory_space<vmem>>) attributes {dimension_semantics = [#tpu.dimension_semantics<parallel>, #tpu.dimension_semantics<parallel>, #tpu.dimension_semantics<parallel>], iteration_bounds = array<i64: 2, 4, 1>, scalar_prefetch = 0 : i64, scratch_operands = 0 : i64, tpu.core_type = #tpu.core_type<tc>, window_params = [{transform_indices = @transform_0, window_bounds = array<i64: 1, 1, 8, 32>}, {transform_indices = @transform_1, window_bounds = array<i64: 1, 1, 8, 32>}, {transform_indices = @transform_2, window_bounds = array<i64: 1, 1, 8, 32>}, {transform_indices = @transform_3, window_bounds = array<i64: 1, 1, 8, 32>}]} {
    %c0 = arith.constant 0 : index
    %c0_0 = arith.constant 0 : index
    %c0_1 = arith.constant 0 : index
    %c0_2 = arith.constant 0 : index
    %0 = vector.load %arg3[%c0, %c0_0, %c0_1, %c0_2] : memref<1x1x8x32xf32, #tpu.memory_space<vmem>>, vector<1x1x8x32xf32>
    %1 = vector.shape_cast %0 : vector<1x1x8x32xf32> to vector<8x32xf32>
    %c0_3 = arith.constant 0 : index
    %c0_4 = arith.constant 0 : index
    %c0_5 = arith.constant 0 : index
    %c0_6 = arith.constant 0 : index
    %2 = vector.load %arg4[%c0_3, %c0_4, %c0_5, %c0_6] : memref<1x1x8x32xf32, #tpu.memory_space<vmem>>, vector<1x1x8x32xf32>
    %3 = vector.shape_cast %2 : vector<1x1x8x32xf32> to vector<8x32xf32>
    %c0_7 = arith.constant 0 : index
    %c0_8 = arith.constant 0 : index
    %c0_9 = arith.constant 0 : index
    %c0_10 = arith.constant 0 : index
    %4 = vector.load %arg5[%c0_7, %c0_8, %c0_9, %c0_10] : memref<1x1x8x32xf32, #tpu.memory_space<vmem>>, vector<1x1x8x32xf32>
    %5 = vector.shape_cast %4 : vector<1x1x8x32xf32> to vector<8x32xf32>
    %cst = arith.constant dense<0.000000e+00> : vector<8x8xf32>
    %6 = tpu.matmul %1, %3, %cst {dimension_numbers = #tpu.dot_dimension_numbers<[1], [1], [0], [0], [0, 0, 1, 0], [], []>} : vector<8x32xf32>, vector<8x32xf32>, vector<8x8xf32> -> vector<8x8xf32>
    %cst_11 = arith.constant dense<0xFF800000> : vector<8xf32>
    %7 = vector.multi_reduction <maximumf>, %6, %cst_11 [1] : vector<8x8xf32> to vector<8xf32>
    %8 = vector.shape_cast %7 : vector<8xf32> to vector<8x1xf32>
    %9 = vector.broadcast %8 : vector<8x1xf32> to vector<8x8xf32>
    %10 = arith.subf %6, %9 : vector<8x8xf32>
    %11 = math.exp %10 : vector<8x8xf32>
    %cst_12 = arith.constant dense<0.000000e+00> : vector<8xf32>
    %12 = vector.multi_reduction <add>, %11, %cst_12 [1] : vector<8x8xf32> to vector<8xf32>
    %13 = vector.shape_cast %12 : vector<8xf32> to vector<8x1xf32>
    %cst_13 = arith.constant dense<0.000000e+00> : vector<8x32xf32>
    %14 = tpu.matmul %11, %5, %cst_13 {dimension_numbers = #tpu.dot_dimension_numbers<[1], [0], [0], [1], [0, 0, 1, 1], [], []>} : vector<8x8xf32>, vector<8x32xf32>, vector<8x32xf32> -> vector<8x32xf32>
    %15 = tpu.reciprocal %13 : vector<8x1xf32> -> vector<8x1xf32>
    %16 = vector.broadcast %15 : vector<8x1xf32> to vector<8x32xf32>
    %17 = arith.mulf %14, %16 : vector<8x32xf32>
    %c0_14 = arith.constant 0 : index
    %c0_15 = arith.constant 0 : index
    %c0_16 = arith.constant 0 : index
    %c0_17 = arith.constant 0 : index
    %18 = vector.load %arg6[%c0_14, %c0_15, %c0_16, %c0_17] : memref<1x1x8x32xf32, #tpu.memory_space<vmem>>, vector<1x1x8x32xf32>
    %19 = vector.shape_cast %18 : vector<1x1x8x32xf32> to vector<8x32xf32>
    %20 = vector.shape_cast %17 : vector<8x32xf32> to vector<1x1x8x32xf32>
    tpu.vector_store %arg6[%c0_14, %c0_15, %c0_16, %c0_17], %20 {strides = array<i32>} : memref<1x1x8x32xf32, #tpu.memory_space<vmem>>, vector<1x1x8x32xf32>,
    return
  }
  func.func @transform_0(%arg0: i32, %arg1: i32, %arg2: i32) -> (i32, i32, i32, i32) {
    %c0_i32 = arith.constant 0 : i32
    %c0_i32_0 = arith.constant 0 : i32
    return %arg0, %arg1, %arg2, %c0_i32 : i32, i32, i32, i32
  }
  func.func @transform_1(%arg0: i32, %arg1: i32, %arg2: i32) -> (i32, i32, i32, i32) {
    %c0_i32 = arith.constant 0 : i32
    %c0_i32_0 = arith.constant 0 : i32
    %c0_i32_1 = arith.constant 0 : i32
    return %arg0, %arg1, %c0_i32, %c0_i32_0 : i32, i32, i32, i32
  }
  func.func @transform_2(%arg0: i32, %arg1: i32, %arg2: i32) -> (i32, i32, i32, i32) {
    %c0_i32 = arith.constant 0 : i32
    %c0_i32_0 = arith.constant 0 : i32
    %c0_i32_1 = arith.constant 0 : i32
    return %arg0, %arg1, %c0_i32, %c0_i32_0 : i32, i32, i32, i32
  }
  func.func @transform_3(%arg0: i32, %arg1: i32, %arg2: i32) -> (i32, i32, i32, i32) {
    %c0_i32 = arith.constant 0 : i32
    %c0_i32_0 = arith.constant 0 : i32
    return %arg0, %arg1, %arg2, %c0_i32 : i32, i32, i32, i32
  }
}

</mosaic_0001>

<bundles_post_ra>
// kernel: tpu_custom_call.1
= control target key start
LH: loop header
LB: loop body
LE: loop exit
PB: predicated region body
PF: predicated region fallthrough
CT: control target
= control target key end

     0   :  { %s1258_s0 = inlined_call_operand.hbm [shape: f32[2,4,8,32], index: 0, kind: input, shape index: {}]   ;;  %s1259_s1 = inlined_call_operand.hbm [shape: f32[2,4,8,32], index: 1, kind: input, shape index: {}]   ;;  %s1260_s2 = inlined_call_operand.hbm [shape: f32[2,4,8,32], index: 2, kind: input, shape index: {}]   ;;  %s1261_s3 = inlined_call_operand.hbm [shape: f32[2,4,8,32], index: 3, kind: output, shape index: {}]  }
   0x1   :  { %1271 = sst [smem:[#allocation18_spill]] %s1259_s1 }
   0x2   :  { %8 = vsyncpa [#allocation3], 0 }
   0x3   :  { %10 = vsyncpa [#allocation3 + $0x1], 0 }
   0x4   :  { %11 = vsyncpa [#allocation6], 0 }
   0x5   :  { %13 = vsyncpa [#allocation6 + $0x1], 0 }
   0x6   :  { %14 = vsyncpa [#allocation4], 0 }
   0x7   :  { %16 = vsyncpa [#allocation4 + $0x1], 0  ;;  %s969_s12 = smov 0   ;;  %s971_s13 = smov 0  }
   0x8   :  { %s973_s14 = smov 0   ;;  %s975_s15 = smov 0  }
   0x9   :  { %s977_s16 = smov 0   ;;  %s979_s17 = smov 0  }
   0xa   :  { %s981_s18 = smov 0   ;;  %s983_s19 = smov 0  }
   0xb LB: > { %1272 = sst [smem:[#allocation12_spill]] %s933_s17  ;;  %s1010_s20 = sadd.s32 4294967295, %s941_s19   ;;  %s941_s19 = sphi %s983_s19, %s22_s19   ;;  %s937_s18 = sphi %s981_s18, %s1299_s18   ;;  %s933_s17 = sphi %s979_s17, %s1298_s17   ;;  %s929_s16 = sphi %s977_s16, %s1297_s16   ;;  %s925_s15 = sphi %s975_s15, %s1296_s15   ;;  %s921_s14 = sphi %s973_s14, %s1302_s14   ;;  %s917_s13 = sphi %s971_s13, %s1301_s13   ;;  %s913_s12 = sphi %s969_s12, %s1300_s12  }
   0xc   : > { %1273 = sst [smem:[#allocation13_spill]] %s937_s18  ;;  %s616_s21 = sadd.s32 4294967294, %s941_s19  }
   0xd   : > { %s37_s22 = sadd.s32 1, %s933_s17  ;;  %s41_s23 = sadd.s32 1, %s937_s18 }
   0xe   : > { %p39_p0 = scmp.ge.s32.totalorder %s37_s22, 4  ;;  %s52_s24 = sadd.s32 1, %s921_s14 }
   0xf   : > { %p59_p1 = scmp.ne.s32.totalorder %s921_s14, %s917_s13  ;;  %p60_p2 = scmp.eq.s32.totalorder %s941_s19, 0 }
  0x10   : > { %s1304_s22 = smov (%p39_p0, %s37_s22), 0  ;;  %s1306_s23 = smov (!%p39_p0, %s41_s23), %s937_s18 }
  0x11   : > { %1274 = sst [smem:[#allocation14_spill]] %s1304_s22  ;;  %s46_s25 = ssub.s32 %s933_s17, %s1304_s22 }
  0x12   : > { %p1024_p3 = por %p60_p2, %p59_p1  ;;  %p43_p4 = scmp.ge.s32.totalorder %s1306_s23, 2 }
  0x13   : > { %p65_p5 = scmp.ne.s32.totalorder %s917_s13, %s913_s12  ;;  %p66_p6 = scmp.eq.s32.totalorder %s1010_s20, 0 }
  0x14   : > { %p149_p7 = scmp.eq.s32.totalorder %s1010_s20, 7  ;;  %s1308_s23 = smov (%p43_p4, %s1306_s23), 0 }
  0x15   : > { %1276 = sst [smem:[#allocation15_spill]] %s1308_s23  ;;  %p1034_p8 = por %p66_p6, %p65_p5 }
  0x16   : > { %p1038_p9 = por %p149_p7, %p59_p1  ;;  %s45_s29 = ssub.s32 %s937_s18, %s1308_s23 }
  0x17   : > { %s1277_s27 = scalar_select %p1034_p8, 1, 0 }
  0x18   : > { %s1278_s28 = scalar_select %p1038_p9, 1, 0 }
  0x19   : > { %p155_p10 = scmp.eq.s32.totalorder %s616_s21, 7  ;;  %s47_s30 = sor.u32 %s46_s25, %s45_s29 }
  0x1a   : > { %p50_p11 = scmp.eq.s32.totalorder %s47_s30, 0  ;;  %p677_p13 = scmp.lt.s32.totalorder %s941_s19, 8 }
  0x1b   : > { %p1044_p12 = por %p155_p10, %p65_p5  ;;  %s1262_s5 = sand.u32 1, %s921_s14  }
  0x1c   : > { %s1051_s6 = scalar_select %p50_p11, %s921_s14, %s52_s24  }
  0x1d   : > { %s1279_s4 = scalar_select %p1044_p12, 1, 0 }
  0x1e   : > { %1281 = sst [smem:[#allocation17_spill]] %s1051_s6  ;;  %s1055_s7 = sshll.u32 %s1262_s5, 3 }
  0x1f   : > { %1280 = sst [smem:[#allocation16_spill]] %s1279_s4  ;;  %s620_s8 = sshll.u32 %s937_s18, 2 }
  0x20   : > { %s185_s9 = sadd.s32 %s933_s17, %s620_s8  ;;  %p1061_p0 = pnand %p677_p13, %p1024_p3 }
  0x21   : > { %s1065_s11 = sshll.u32 %s185_s9, 7  ;;  %s196_s21 = sand.u32 1, %s941_s19  }
  0x22   : > { %s1282_s10 = scalar_select %p1061_p0, 1, 0 }
  0x23   : > { %s1283_s1 = sld [smem:[#allocation18_spill]]  ;;  %s200_s30 = scalar_lea.vmem [#allocation5], %s1055_s7 }
  0x24   : > { %s209_s26 = sshll.u32 %s200_s30, 4  ;;  %s1079_s8 = scalar_lea.sflag [#allocation6], %s196_s21  ;;  %s1076_s26 = int_to_ptr.vmem [resolvable:$true] %s209_s26 }
  0x25   : > { %p1085_p4 = pneg %p1061_p0 }
  0x29   : > { %s1072_s24 = scalar_lea.hbm %s1283_s1, %s1065_s11  ;;  %s754_s30 = scalar_lea.hbm %s1283_s1, 1024 }
  0x2a   : > { %s749_s9 = scalar_lea.hbm %s1072_s24, 128  ;;  %p755_p7 = scmp.lt.u32.totalorder %s1072_s24, %s1283_s1 }
  0x2b   : > { %p750_p3 = scmp.ne.s32.totalorder %s1072_s24, %s749_s9  ;;  %p756_p10 = scmp.lt.u32.totalorder %s754_s30, %s749_s9 }
  0x2c   : > { %p758_p13 = scmp.lt.u32.totalorder %s749_s9, %s1072_s24 }
  0x2d   : > { %p752_p5 = pnand %p1085_p4, %p750_p3  ;;  %p757_p11 = por %p756_p10, %p755_p7 }
  0x2f   : > { %p753_p6 = pneg %p752_p5  ;;  %p759_p1 = por %p758_p13, %p757_p11 }
  0x31   : > { %p760_p2 = pnand %p759_p1, %p753_p6 }
  0x33   : > { %763 = shalt.err (!%p760_p2)
}
  0x34   : > { %s764_s21 = scalar_lea.vmem %s1076_s26, 128  ;;  %s943_s25 = smov [#allocation5]  }
  0x35   : > { %p765_p3 = scmp.ne.s32.totalorder %s1076_s26, %s764_s21  ;;  %s769_s29 = sshll.u32 %s943_s25, 4  ;;  %s770_s29 = int_to_ptr.vmem [resolvable:$false] %s769_s29 }
  0x36   : > { %s771_s22 = scalar_lea.vmem %s770_s29, 256  ;;  %p772_p9 = scmp.lt.s32.totalorder %s1076_s26, %s770_s29 }
  0x37   : > { %p767_p5 = pnand %p765_p3, %p1085_p4  ;;  %p773_p8 = scmp.lt.s32.totalorder %s771_s22, %s764_s21 }
  0x39   : > { %p768_p12 = pneg %p767_p5  ;;  %p774_p7 = por %p773_p8, %p772_p9 }
  0x3b   : > { %p775_p10 = pnand %p774_p7, %p768_p12 }
  0x3d   : > { %778 = shalt.err (!%p775_p10)
}
  0x3e   : > { %669 = dma.hbm_to_vmem [thread:$0]  (!%p1061_p0), %s1072_s24, 128, %s1076_s26, %s1079_s8  }
  0x3f   : > { %p1285_p1 = scmp.lt.s32.totalorder %s941_s19, 9  ;;  %p1286_p2 = scmp.ge.s32.totalorder %s941_s19, 1 }
  0x40   : > { %s1121_s21 = scalar_lea.hbm %s1258_s0, %s1065_s11  ;;  %s179_s25 = scalar_lea.vmem [#allocation2], %s1055_s7 }
  0x41   : > { %p1113_p6 = pnand %p1286_p2, %p1285_p1  ;;  %s189_s29 = sshll.u32 %s179_s25, 4  ;;  %s1124_s29 = int_to_ptr.vmem [resolvable:$true] %s189_s29 }
  0x42   : > { %s1130_s22 = scalar_lea.hbm %s1260_s2, %s1065_s11  ;;  %s1288_s1 = sand.u32 1, %s921_s14  }
  0x43   : > { %s1287_s23 = scalar_select %p1113_p6, 1, 0 }
  0x44   : > { %s176_s18 = scalar_lea.sflag [#allocation3], %s1288_s1  ;;  %s779_s17 = scalar_lea.hbm %s1121_s21, 128 }
  0x45   : > { %p780_p8 = scmp.ne.s32.totalorder %s1121_s21, %s779_s17  ;;  %s784_s6 = scalar_lea.hbm %s1258_s0, 1024 }
  0x46   : > { %p785_p11 = scmp.lt.u32.totalorder %s1121_s21, %s1258_s0  ;;  %p786_p13 = scmp.lt.u32.totalorder %s784_s6, %s779_s17 }
  0x47   : > { %p782_p9 = pnand %p780_p8, %p1085_p4  ;;  %p788_p5 = scmp.lt.u32.totalorder %s779_s17, %s1121_s21 }
  0x48   : > { %p787_p3 = por %p786_p13, %p785_p11 }
  0x49   : > { %p783_p12 = pneg %p782_p9 }
  0x4a   : > { %p789_p7 = por %p788_p5, %p787_p3 }
  0x4c   : > { %p790_p10 = pnand %p789_p7, %p783_p12 }
  0x4e   : > { %793 = shalt.err (!%p790_p10)
}
  0x4f   : > { %s794_s1 = scalar_lea.vmem %s1124_s29, 128  ;;  %s944_s11 = smov [#allocation2]  }
  0x50   : > { %p795_p1 = scmp.ne.s32.totalorder %s1124_s29, %s794_s1  ;;  %s799_s24 = sshll.u32 %s944_s11, 4  ;;  %s800_s24 = int_to_ptr.vmem [resolvable:$false] %s799_s24 }
  0x51   : > { %s801_s4 = scalar_lea.vmem %s800_s24, 256  ;;  %p802_p9 = scmp.lt.s32.totalorder %s1124_s29, %s800_s24 }
  0x52   : > { %p797_p2 = pnand %p795_p1, %p1085_p4  ;;  %p803_p6 = scmp.lt.s32.totalorder %s801_s4, %s794_s1 }
  0x54   : > { %p798_p8 = pneg %p797_p2  ;;  %p804_p11 = por %p803_p6, %p802_p9 }
  0x56   : > { %p805_p13 = pnand %p804_p11, %p798_p8 }
  0x58   : > { %808 = shalt.err (!%p805_p13)
}
  0x59   : > { %666 = dma.hbm_to_vmem [thread:$0]  (!%p1061_p0), %s1121_s21, 128, %s1124_s29, %s176_s18  }
  0x5a   : > { %s220_s17 = scalar_lea.vmem [#allocation7], %s1055_s7  ;;  %s809_s26 = scalar_lea.hbm %s1130_s22, 128 }
  0x5b   : > { %s229_s6 = sshll.u32 %s220_s17, 4  ;;  %p810_p12 = scmp.ne.s32.totalorder %s1130_s22, %s809_s26  ;;  %s230_s6 = int_to_ptr.vmem [resolvable:$true] %s229_s6 }
  0x5c   : > { %s814_s25 = scalar_lea.hbm %s1260_s2, 1024  ;;  %p815_p5 = scmp.lt.u32.totalorder %s1130_s22, %s1260_s2 }
  0x5d   : > { %p812_p6 = pnand %p810_p12, %p1085_p4  ;;  %p816_p7 = scmp.lt.u32.totalorder %s814_s25, %s809_s26 }
  0x5e   : > { %p818_p1 = scmp.lt.u32.totalorder %s809_s26, %s1130_s22 }
  0x5f   : > { %p813_p3 = pneg %p812_p6  ;;  %p817_p10 = por %p816_p7, %p815_p5 }
  0x61   : > { %p819_p2 = por %p818_p1, %p817_p10 }
  0x63   : > { %p820_p8 = pnand %p819_p2, %p813_p3 }
  0x65   : > { %823 = shalt.err (!%p820_p8)
}
  0x66   : > { %s824_s18 = scalar_lea.vmem %s230_s6, 128  ;;  %s945_s7 = smov [#allocation7]  }
  0x67   : > { %p825_p9 = scmp.ne.s32.totalorder %s230_s6, %s824_s18  ;;  %s829_s21 = sshll.u32 %s945_s7, 4  ;;  %s830_s21 = int_to_ptr.vmem [resolvable:$false] %s829_s21 }
  0x68   : > { %s831_s29 = scalar_lea.vmem %s830_s21, 256  ;;  %p832_p12 = scmp.lt.s32.totalorder %s230_s6, %s830_s21 }
  0x69   : > { %p827_p11 = pnand %p825_p9, %p1085_p4  ;;  %p833_p6 = scmp.lt.s32.totalorder %s831_s29, %s824_s18 }
  0x6b   : > { %p828_p13 = pneg %p827_p11  ;;  %p834_p0 = por %p833_p6, %p832_p12 }
  0x6d   : > { %p835_p5 = pnand %p834_p0, %p828_p13 }
  0x6f   : > { %838 = shalt.err (!%p835_p5)
}
  0x70   : > { %p1289_p7 = scmp.ne.s32.totalorder %s1282_s10, 0  ;;  %p1290_p3 = scmp.ne.s32.totalorder %s1287_s23, 0 }
  0x71   : > { %s1177_s5 = sand.u32 (!%p1290_p3), 1, %s917_s13   ;;  %p1291_p0 = scmp.ne.s32.totalorder (!%p1290_p3), %s1277_s27, 0 }
  0x72   : > { %672 = dma.hbm_to_vmem [thread:$0]  (!%p1289_p7), %s1130_s22, 128, %s230_s6, %s1079_s8  }
  0x73   : > { %238 = sbr.rel (%p1290_p3) target bundleno = 730 (0x2da), region = 32  ;;  %s1180_s24 = sshll.u32 (!%p1290_p3), %s1177_s5, 3 }
  0x74   : > { %s241_s4 = scalar_lea.sflag (!%p1290_p3), [#allocation3], %s1177_s5  ;;  %s244_s17 = scalar_lea.vmem (!%p1290_p3), [#allocation2], %s1180_s24 }
  0x7a   : > { %900 = dma.done.wait (%p1291_p0), %s241_s4, 128  }
  0x7b   : > { %902 = vsyncadd (%p1291_p0), %s241_s4, 4294967168  ;;  %s249_s10 = sand.u32 1, %s1010_s20   ;;  %s253_s23 = scalar_lea.vmem [#allocation5], %s1180_s24 }
  0x7c   : > { %s250_s8 = scalar_lea.sflag [#allocation6], %s249_s10 }
  0x7d   : > { %904 = dma.done.wait (%p1291_p0), %s250_s8, 256  }
  0x7e   : > { %906 = vsyncadd (%p1291_p0), %s250_s8, 4294967040  ;;  %v946_v0 = vmov 0.0   ;;  %vm947_vm0 = vmmov 0   ;;  %vm298_vm1 = vcmask 261120   ;;  %v296_v1 = vld [vmem:[%s253_s23] sm:$0xff]  ;;  %v295_v2 = vld [vmem:[%s244_s17] sm:$0xff] }
  0x7f   : > { %645 = vmatprep.subr.mxu0 %v946_v0  ;;  %647 = vmatprep.mubr.msk.f32.mxu0 %vm947_vm0, %v946_v0  ;;  %vm375_vm2 = vcmask 64512   ;;  %s262_s20 = scalar_lea.vmem [#allocation7], %s1180_s24  ;;  %s637_s27 = sshll.u32 %s929_s16, 2 }
  0x80   : > { %650 = vmatprep.subr.mxu1 %v946_v0  ;;  %652 = vmatprep.mubr.msk.f32.mxu1 %vm947_vm0, %v946_v0  ;;  %v297_v6 = vld [vmem:[%s262_s20] sm:$0xff]  ;;  %s474_s22 = sadd.s32 %s925_s15, %s637_s27  ;;  %s294_s26 = scalar_lea.vmem [#allocation8], %s1180_s24 }
  0x81   : > { %646 = vmatpush3.xpose.msk.msra.mxu0 %vm298_vm1, %v296_v1  ;;  %651 = vmatpush3.msra.mxu1 %v297_v6  ;;  %s638_s6 = sshll.u32 %s474_s22, 7  ;;  %s478_s9 = sshll.u32 %s294_s26, 4  ;;  %s1205_s9 = int_to_ptr.vmem [resolvable:$true] %s478_s9 }
  0x82   : > { %s1203_s1 = scalar_lea.hbm %s1261_s3, %s638_s6  ;;  %s462_s15 = scalar_lea.sflag [#allocation4], %s1177_s5 }
  0x83   : > { %s839_s16 = scalar_lea.vmem %s1205_s9, 128  ;;  %p1292_p10 = scmp.ne.s32.totalorder %s1278_s28, 0 }
  0x84   : > { %648 = vmatmul.mubr.msk.f32.vlgmr.msra.gmra.mrb[0].mxu0 %vm298_vm1, %v295_v2  ;;  %p840_p4 = scmp.ne.s32.totalorder %s1205_s9, %s839_s16  ;;  %s948_s11 = smov [#allocation8]  }
  0x85   : > { %s843_s18 = sshll.u32 %s948_s11, 4  ;;  %s844_s18 = int_to_ptr.vmem [resolvable:$false] %s843_s18 }
  0x86   : > { %p841_p1 = pnand %p840_p4, %p1292_p10  ;;  %s845_s7 = scalar_lea.vmem %s844_s18, 256 }
  0x87   : > { %p846_p8 = scmp.lt.s32.totalorder %s1205_s9, %s844_s18  ;;  %p847_p9 = scmp.lt.s32.totalorder %s845_s7, %s839_s16 }
  0x88   : > { %p842_p2 = pneg %p841_p1 }
  0x89   : > { %p848_p11 = por %p847_p9, %p846_p8 }
  0x8b   : > { %p849_p13 = pnand %p848_p11, %p842_p2 }
 0x157   : > { %v371_v3 = vpop.f32.mrb[0].mxu0 }
 0x158   : > { %v649_v4 = vpop.f32.mrb[1].mxu0  ;;  %v376_v5 = vsel %vm375_vm2, %v371_v3, -inf }
 0x159   : > { %377 = vmax.xlane.f32.xlu0 %v376_v5 }
 0x1e6   : > { %v378_v7 = vpop.xlane.xlu0 %377 }
 0x1e7   : > { %v379_v8 = vsub.f32 %v371_v3, %v378_v7 }
 0x1e9   : > { %v380_v9 = vmul.f32 1.442695, %v379_v8 }
 0x1eb   : > { %745 = vpow2.f32 %v380_v9 }
 0x1f5   : > { %v746_v10 = vpop.eup %745 }
 0x1f6   : > { %653 = vmatmul.mubr.msk.f32.vlgmr.msra.gmra.mrb[0].mxu1 %vm375_vm2, %v746_v10  ;;  %v382_v11 = vsel %vm375_vm2, %v746_v10, 0.0 }
 0x1f7   : > { %383 = vadd.xlane.f32.xlu0 %v382_v11 }
 0x284   : > { %v384_v12 = vpop.xlane.xlu0 %383 }
 0x285   : > { %747 = vrcp.f32 %v384_v12 }
 0x28f   : > { %v748_v13 = vpop.eup %747 }
 0x2c9   : > { %v454_v14 = vpop.f32.mrb[0].mxu1 }
 0x2ca   : > { %v459_v15 = vmul.f32 %v748_v13, %v454_v14  ;;  %v654_v16 = vpop.f32.mrb[1].mxu1 }
 0x2cc   : > { %460 = vst.msk [vmem:[%s294_s26] sm:$0xff] %vm298_vm1, %v459_v15 }
 0x2cd   : > { %852 = shalt.err (!%p849_p13)
}
 0x2ce   : > { %s853_s21 = scalar_lea.hbm %s1203_s1, 128  ;;  %s857_s24 = scalar_lea.hbm %s1261_s3, 1024 }
 0x2cf   : > { %p854_p12 = scmp.ne.s32.totalorder %s1203_s1, %s853_s21  ;;  %p858_p7 = scmp.lt.u32.totalorder %s1203_s1, %s1261_s3 }
 0x2d0   : > { %p859_p3 = scmp.lt.u32.totalorder %s857_s24, %s853_s21  ;;  %p861_p4 = scmp.lt.u32.totalorder %s853_s21, %s1203_s1 }
 0x2d1   : > { %p855_p6 = pnand %p854_p12, %p1292_p10 }
 0x2d2   : > { %p860_p0 = por %p859_p3, %p858_p7 }
 0x2d3   : > { %p856_p5 = pneg %p855_p6 }
 0x2d4   : > { %p862_p1 = por %p861_p4, %p860_p0 }
 0x2d6   : > { %p863_p2 = pnand %p862_p1, %p856_p5 }
 0x2d8   : > { %866 = shalt.err (!%p863_p2)
}
 0x2d9   : > { %661 = dma.vmem_to_hbm [thread:$0]  (%p1292_p10), %s1205_s9, 128, %s1203_s1, %s462_s15  }
 0x2da PF: > { %s1293_s10 = sld [smem:[#allocation16_spill]]  ;;  %p678_p8 = scmp.ge.s32.totalorder %s941_s19, 2 }
 0x2db   : > { %s490_s8 = sand.u32 1, %s913_s12  }
 0x2dc   : > { %s491_s23 = scalar_lea.sflag [#allocation4], %s490_s8 }
 0x2e0   : > { %p1294_p9 = scmp.ne.s32.totalorder %s1293_s10, 0 }
 0x2e2   : > { %p674_p11 = pnand %p678_p8, %p1294_p9 }
 0x2e4   : > { %908 = dma.done.wait (!%p674_p11), %s491_s23, 128  }
 0x2e5   : > { %910 = vsyncadd (!%p674_p11), %s491_s23, 4294967168  ;;  %s22_s19 = sadd.s32 1, %s941_s19   ;;  %s1295_s28 = sld [smem:[#allocation17_spill]] }
 0x2e6   : > { %p19_p13 = scmp.ge.s32.totalorder %s22_s19, 10   ;;  %s1296_s15 = sld [smem:[#allocation12_spill]] }
 0x2e7   : > { %s1297_s16 = sld [smem:[#allocation13_spill]]  ;;  %s1298_s17 = sld [smem:[#allocation14_spill]] }
 0x2e8   : > { %s1299_s18 = sld [smem:[#allocation15_spill]]  ;;  %s1300_s12 = smov %s917_s13 }
 0x2e9   : > { %s1301_s13 = smov %s921_s14  ;;  %21 = sbr.rel (!%p19_p13) target bundleno = 11 (0xb), region = 101 }
 0x2eb   : > { %s1302_s14 = smov %s1295_s28 }
 0x2f0   :  { %496 = vsyncpa [#allocation3], 1 }
 0x2f1   :  { %498 = vsyncpa [#allocation3 + $0x1], 1 }
 0x2f2   :  { %499 = vsyncpa [#allocation6], 1 }
 0x2f3   :  { %501 = vsyncpa [#allocation6 + $0x1], 1 }
 0x2f4   :  { %502 = vsyncpa [#allocation4], 1 }
 0x2f5   :  { %504 = vsyncpa [#allocation4 + $0x1], 1 }

</bundles_post_ra>
